<compile_context>
chip_gen: v5e
topology: v5e:2x2
jax: 0.10.0
libtpu: 0.0.40
codegen_flags: <defaults>
</compile_context>

<pallas_src>
import jax
import jax.numpy as jnp
from jax.experimental import pallas as pl
from jax.experimental.pallas import tpu as pltpu


def _round_up(n, m):
    return ((n + m - 1) // m) * m


def ann_tlc_kernel(x_ref, w_in_ref, b_in_ref, w_h_ref, b_h_ref,
                   w_out_ref, b_out_ref, o_ref):
    # Matmul-operand dtype (f32 or bf16); accumulation & elementwise stay f32.
    cd = w_in_ref.dtype
    tb = x_ref.shape[0]
    hidden = w_h_ref.shape[1]

    def leaky_relu(v):
        return jnp.where(v > 0, v, 0.01 * v)

    x = x_ref[...]  # already cast to `cd` at the call boundary

    # input_layer + leaky_relu (f32 accumulate, f32 bias, f32 activation)
    h = jnp.dot(x, w_in_ref[...], preferred_element_type=jnp.float32) + b_in_ref[...]
    h = leaky_relu(h)

    # hidden_layer applied 3 times with the SAME weights (as in the PyTorch
    # module).  Weight load and bias broadcast hoisted out of the loop.
    w_h = w_h_ref[...]
    b_h = jnp.broadcast_to(b_h_ref[...], (tb, hidden))
    for _ in range(3):
        h = jnp.dot(h.astype(cd), w_h, preferred_element_type=jnp.float32) + b_h
        h = leaky_relu(h)

    # output_layer + numerically stable sigmoid.
    # exp and the approximate reciprocal both run on the EUP slot.
    logits = (jnp.dot(h.astype(cd), w_out_ref[...],
                      preferred_element_type=jnp.float32) + b_out_ref[...])
    z = jnp.exp(-jnp.abs(logits))                     # in (0, 1], never overflows
    inv = pl.reciprocal(1.0 + z, approx=True)         # sigmoid(|logits|)
    o_ref[...] = jnp.where(logits >= 0, inv, 1.0 - inv).astype(o_ref.dtype)


def ann_tlc_forward(x, w_in, b_in, w_h, b_h, w_out, b_out,
                    *, block_rows=2048, compute_dtype=jnp.float32):
    """Run the ANN_TLC forward pass as a batch-tiled Pallas kernel.

    compute_dtype: dtype fed to the MXU for x / weights (use jnp.bfloat16 on
    v6e/v7x at large batch).  Biases, accumulation and the elementwise path
    stay float32 on every chip generation.
    """
    batch, in_neuron = x.shape
    hidden = w_h.shape[1]
    out_neuron = w_out.shape[1]

    # Cast matmul operands only; keep biases in f32.
    x = x.astype(compute_dtype)
    w_in = w_in.astype(compute_dtype)
    w_h = w_h.astype(compute_dtype)
    w_out = w_out.astype(compute_dtype)
    b_in = b_in.astype(jnp.float32)
    b_h = b_h.astype(jnp.float32)
    b_out = b_out.astype(jnp.float32)

    # Large batch tile (multiple of 8) to amortize the ~0.35 us per-grid-step
    # overhead; pad the batch so the grid divides evenly (rows-only padding,
    # sliced off below — the network is purely row-wise).
    tb = min(block_rows, _round_up(batch, 8))
    tb = _round_up(tb, 8)
    padded = _round_up(batch, tb)
    if padded != batch:
        x = jnp.pad(x, ((0, padded - batch), (0, 0)))
    grid = (padded // tb,)

    out = pl.pallas_call(
        ann_tlc_kernel,
        out_shape=jax.ShapeDtypeStruct((padded, out_neuron), jnp.float32),
        grid_spec=pltpu.PrefetchScalarGridSpec(
            num_scalar_prefetch=0,
            grid=grid,
            in_specs=[
                # x: streamed / double-buffered per batch tile.
                pl.BlockSpec((tb, in_neuron), lambda i: (i, 0)),
                # Weights & biases: constant index map -> resident in VMEM,
                # DMA'd once, not re-copied per grid step.
                pl.BlockSpec((in_neuron, hidden), lambda i: (0, 0)),
                pl.BlockSpec((1, hidden), lambda i: (0, 0)),
                pl.BlockSpec((hidden, hidden), lambda i: (0, 0)),
                pl.BlockSpec((1, hidden), lambda i: (0, 0)),
                pl.BlockSpec((hidden, out_neuron), lambda i: (0, 0)),
                pl.BlockSpec((1, out_neuron), lambda i: (0, 0)),
            ],
            out_specs=pl.BlockSpec((tb, out_neuron), lambda i: (i, 0)),
        ),
        compiler_params=pltpu.CompilerParams(
            dimension_semantics=("parallel",),  # megacore sharding on v7x
        ),
    )(x, w_in, b_in, w_h, b_h, w_out, b_out)

    return out[:batch]


def init_linear_params(key, fan_in, fan_out):
    """Deterministic init mimicking PyTorch nn.Linear (uniform +/- 1/sqrt(fan_in)).
    Weight stored as (fan_in, fan_out) = transpose of the PyTorch layout."""
    kw, kb = jax.random.split(key)
    bound = 1.0 / jnp.sqrt(jnp.float32(fan_in))
    w = jax.random.uniform(kw, (fan_in, fan_out), jnp.float32, -bound, bound)
    b = jax.random.uniform(kb, (1, fan_out), jnp.float32, -bound, bound)
    return w, b


def reference_forward(x, w_in, b_in, w_h, b_h, w_out, b_out):
    def leaky_relu(v):
        return jnp.where(v > 0, v, 0.01 * v)
    h = leaky_relu(x @ w_in + b_in)
    for _ in range(3):
        h = leaky_relu(h @ w_h + b_h)
    return jax.nn.sigmoid(h @ w_out + b_out)


if __name__ == "__main__":
    # Shapes consistent with the module: in_neuron=16, hidden=32, out=8.
    in_neuron, hidden_neuron, out_neuron = 16, 32, 8

    key = jax.random.PRNGKey(0)
    k_x, k_in, k_h, k_out = jax.random.split(key, 4)

    w_in, b_in = init_linear_params(k_in, in_neuron, hidden_neuron)
    w_h, b_h = init_linear_params(k_h, hidden_neuron, hidden_neuron)
    w_out, b_out = init_linear_params(k_out, hidden_neuron, out_neuron)

    # 1) Small smoke test (single grid step, f32 everywhere).
    batch = 8
    x = jax.random.normal(k_x, (batch, in_neuron), jnp.float32)
    y = ann_tlc_forward(x, w_in, b_in, w_h, b_h, w_out, b_out)
    jax.block_until_ready(y)
    y_ref = reference_forward(x, w_in, b_in, w_h, b_h, w_out, b_out)
    assert y.shape == (batch, out_neuron)
    # tolerance covers pl.reciprocal(approx=True)
    assert jnp.allclose(y, y_ref, atol=5e-3, rtol=5e-3)

    # 2) Multi-step grid + ragged batch padding + resident weights across
    #    steps + bf16 matmul operands (v6e/v7x path), still small shapes.
    batch2 = 300
    x2 = jax.random.normal(k_x, (batch2, in_neuron), jnp.float32)
    y2 = ann_tlc_forward(x2, w_in, b_in, w_h, b_h, w_out, b_out,
                         block_rows=128, compute_dtype=jnp.bfloat16)
    jax.block_until_ready(y2)
    y2_ref = reference_forward(x2, w_in, b_in, w_h, b_h, w_out, b_out)
    assert y2.shape == (batch2, out_neuron)
    assert jnp.allclose(y2, y2_ref, atol=5e-2, rtol=5e-2)

    print("KERNEL_OK")
</pallas_src>

<mosaic_0001>
module attributes {stable_mosaic.version = 11 : i64} {
  func.func @ann_tlc_kernel(%arg0: i32, %arg1: memref<8x16xf32, #tpu.memory_space<vmem>>, %arg2: memref<16x32xf32, #tpu.memory_space<vmem>>, %arg3: memref<1x32xf32, #tpu.memory_space<vmem>>, %arg4: memref<32x32xf32, #tpu.memory_space<vmem>>, %arg5: memref<1x32xf32, #tpu.memory_space<vmem>>, %arg6: memref<32x8xf32, #tpu.memory_space<vmem>>, %arg7: memref<1x8xf32, #tpu.memory_space<vmem>>, %arg8: memref<8x8xf32, #tpu.memory_space<vmem>>) attributes {dimension_semantics = [#tpu.dimension_semantics<parallel>], iteration_bounds = array<i64: 1>, scalar_prefetch = 0 : i64, scratch_operands = 0 : i64, tpu.core_type = #tpu.core_type<tc>, window_params = [{transform_indices = @transform_0, window_bounds = array<i64: 8, 16>}, {pipeline_mode = #tpu.pipeline_mode<synchronous>, transform_indices = @transform_1, window_bounds = array<i64: 16, 32>}, {pipeline_mode = #tpu.pipeline_mode<synchronous>, transform_indices = @transform_2, window_bounds = array<i64: 1, 32>}, {pipeline_mode = #tpu.pipeline_mode<synchronous>, transform_indices = @transform_3, window_bounds = array<i64: 32, 32>}, {pipeline_mode = #tpu.pipeline_mode<synchronous>, transform_indices = @transform_4, window_bounds = array<i64: 1, 32>}, {pipeline_mode = #tpu.pipeline_mode<synchronous>, transform_indices = @transform_5, window_bounds = array<i64: 32, 8>}, {pipeline_mode = #tpu.pipeline_mode<synchronous>, transform_indices = @transform_6, window_bounds = array<i64: 1, 8>}, {transform_indices = @transform_7, window_bounds = array<i64: 8, 8>}]} {
    %c0 = arith.constant 0 : index
    %c0_0 = arith.constant 0 : index
    %0 = vector.load %arg1[%c0, %c0_0] : memref<8x16xf32, #tpu.memory_space<vmem>>, vector<8x16xf32>
    %c0_1 = arith.constant 0 : index
    %c0_2 = arith.constant 0 : index
    %1 = vector.load %arg2[%c0_1, %c0_2] : memref<16x32xf32, #tpu.memory_space<vmem>>, vector<16x32xf32>
    %cst = arith.constant dense<0.000000e+00> : vector<8x32xf32>
    %2 = tpu.matmul %0, %1, %cst {dimension_numbers = #tpu.dot_dimension_numbers<[1], [0], [0], [1], [0, 0, 1, 1], [], []>} : vector<8x16xf32>, vector<16x32xf32>, vector<8x32xf32> -> vector<8x32xf32>
    %c0_3 = arith.constant 0 : index
    %c0_4 = arith.constant 0 : index
    %3 = vector.load %arg3[%c0_3, %c0_4] : memref<1x32xf32, #tpu.memory_space<vmem>>, vector<1x32xf32>
    %4 = vector.broadcast %3 : vector<1x32xf32> to vector<8x32xf32>
    %5 = arith.addf %2, %4 : vector<8x32xf32>
    %cst_5 = arith.constant 0.000000e+00 : f32
    %6 = vector.broadcast %cst_5 : f32 to vector<8x32xf32>
    %7 = arith.cmpf ogt, %5, %6 : vector<8x32xf32>
    %cst_6 = arith.constant 0.00999999977 : f32
    %8 = vector.broadcast %cst_6 : f32 to vector<8x32xf32>
    %9 = arith.mulf %8, %5 : vector<8x32xf32>
    %10 = arith.select %7, %5, %9 : vector<8x32xi1>, vector<8x32xf32>
    %c0_7 = arith.constant 0 : index
    %c0_8 = arith.constant 0 : index
    %11 = vector.load %arg4[%c0_7, %c0_8] : memref<32x32xf32, #tpu.memory_space<vmem>>, vector<32x32xf32>
    %c0_9 = arith.constant 0 : index
    %c0_10 = arith.constant 0 : index
    %12 = vector.load %arg5[%c0_9, %c0_10] : memref<1x32xf32, #tpu.memory_space<vmem>>, vector<1x32xf32>
    %13 = vector.shape_cast %12 : vector<1x32xf32> to vector<1x32xf32>
    %14 = vector.broadcast %13 : vector<1x32xf32> to vector<8x32xf32>
    %cst_11 = arith.constant dense<0.000000e+00> : vector<8x32xf32>
    %15 = tpu.matmul %10, %11, %cst_11 {dimension_numbers = #tpu.dot_dimension_numbers<[1], [0], [0], [1], [0, 0, 1, 1], [], []>} : vector<8x32xf32>, vector<32x32xf32>, vector<8x32xf32> -> vector<8x32xf32>
    %16 = arith.addf %15, %14 : vector<8x32xf32>
    %cst_12 = arith.constant 0.000000e+00 : f32
    %17 = vector.broadcast %cst_12 : f32 to vector<8x32xf32>
    %18 = arith.cmpf ogt, %16, %17 : vector<8x32xf32>
    %cst_13 = arith.constant 0.00999999977 : f32
    %19 = vector.broadcast %cst_13 : f32 to vector<8x32xf32>
    %20 = arith.mulf %19, %16 : vector<8x32xf32>
    %21 = arith.select %18, %16, %20 : vector<8x32xi1>, vector<8x32xf32>
    %cst_14 = arith.constant dense<0.000000e+00> : vector<8x32xf32>
    %22 = tpu.matmul %21, %11, %cst_14 {dimension_numbers = #tpu.dot_dimension_numbers<[1], [0], [0], [1], [0, 0, 1, 1], [], []>} : vector<8x32xf32>, vector<32x32xf32>, vector<8x32xf32> -> vector<8x32xf32>
    %23 = arith.addf %22, %14 : vector<8x32xf32>
    %cst_15 = arith.constant 0.000000e+00 : f32
    %24 = vector.broadcast %cst_15 : f32 to vector<8x32xf32>
    %25 = arith.cmpf ogt, %23, %24 : vector<8x32xf32>
    %cst_16 = arith.constant 0.00999999977 : f32
    %26 = vector.broadcast %cst_16 : f32 to vector<8x32xf32>
    %27 = arith.mulf %26, %23 : vector<8x32xf32>
    %28 = arith.select %25, %23, %27 : vector<8x32xi1>, vector<8x32xf32>
    %cst_17 = arith.constant dense<0.000000e+00> : vector<8x32xf32>
    %29 = tpu.matmul %28, %11, %cst_17 {dimension_numbers = #tpu.dot_dimension_numbers<[1], [0], [0], [1], [0, 0, 1, 1], [], []>} : vector<8x32xf32>, vector<32x32xf32>, vector<8x32xf32> -> vector<8x32xf32>
    %30 = arith.addf %29, %14 : vector<8x32xf32>
    %cst_18 = arith.constant 0.000000e+00 : f32
    %31 = vector.broadcast %cst_18 : f32 to vector<8x32xf32>
    %32 = arith.cmpf ogt, %30, %31 : vector<8x32xf32>
    %cst_19 = arith.constant 0.00999999977 : f32
    %33 = vector.broadcast %cst_19 : f32 to vector<8x32xf32>
    %34 = arith.mulf %33, %30 : vector<8x32xf32>
    %35 = arith.select %32, %30, %34 : vector<8x32xi1>, vector<8x32xf32>
    %c0_20 = arith.constant 0 : index
    %c0_21 = arith.constant 0 : index
    %36 = vector.load %arg6[%c0_20, %c0_21] : memref<32x8xf32, #tpu.memory_space<vmem>>, vector<32x8xf32>
    %cst_22 = arith.constant dense<0.000000e+00> : vector<8x8xf32>
    %37 = tpu.matmul %35, %36, %cst_22 {dimension_numbers = #tpu.dot_dimension_numbers<[1], [0], [0], [1], [0, 0, 1, 1], [], []>} : vector<8x32xf32>, vector<32x8xf32>, vector<8x8xf32> -> vector<8x8xf32>
    %c0_23 = arith.constant 0 : index
    %c0_24 = arith.constant 0 : index
    %38 = vector.load %arg7[%c0_23, %c0_24] : memref<1x8xf32, #tpu.memory_space<vmem>>, vector<1x8xf32>
    %39 = vector.broadcast %38 : vector<1x8xf32> to vector<8x8xf32>
    %40 = arith.addf %37, %39 : vector<8x8xf32>
    %41 = math.absf %40 : vector<8x8xf32>
    %cst_25 = arith.constant 0.000000e+00 : f32
    %42 = vector.broadcast %cst_25 : f32 to vector<8x8xf32>
    %43 = arith.subf %42, %41 : vector<8x8xf32>
    %44 = math.exp %43 : vector<8x8xf32>
    %cst_26 = arith.constant 1.000000e+00 : f32
    %45 = vector.broadcast %cst_26 : f32 to vector<8x8xf32>
    %46 = arith.addf %45, %44 : vector<8x8xf32>
    %47 = tpu.reciprocal %46 {approx = true} : vector<8x8xf32> -> vector<8x8xf32>
    %cst_27 = arith.constant 0.000000e+00 : f32
    %48 = vector.broadcast %cst_27 : f32 to vector<8x8xf32>
    %49 = arith.cmpf oge, %40, %48 : vector<8x8xf32>
    %cst_28 = arith.constant 1.000000e+00 : f32
    %50 = vector.broadcast %cst_28 : f32 to vector<8x8xf32>
    %51 = arith.subf %50, %47 : vector<8x8xf32>
    %52 = arith.select %49, %47, %51 : vector<8x8xi1>, vector<8x8xf32>
    %c0_29 = arith.constant 0 : index
    %c0_30 = arith.constant 0 : index
    %53 = vector.load %arg8[%c0_29, %c0_30] : memref<8x8xf32, #tpu.memory_space<vmem>>, vector<8x8xf32>
    tpu.vector_store %arg8[%c0_29, %c0_30], %52 {strides = array<i32>} : memref<8x8xf32, #tpu.memory_space<vmem>>, vector<8x8xf32>,
    return
  }
  func.func @transform_0(%arg0: i32) -> (i32, i32) {
    %c0_i32 = arith.constant 0 : i32
    %c0_i32_0 = arith.constant 0 : i32
    return %arg0, %c0_i32 : i32, i32
  }
  func.func @transform_1(%arg0: i32) -> (i32, i32) {
    %c0_i32 = arith.constant 0 : i32
    %c0_i32_0 = arith.constant 0 : i32
    %c0_i32_1 = arith.constant 0 : i32
    return %c0_i32, %c0_i32_0 : i32, i32
  }
  func.func @transform_2(%arg0: i32) -> (i32, i32) {
    %c0_i32 = arith.constant 0 : i32
    %c0_i32_0 = arith.constant 0 : i32
    %c0_i32_1 = arith.constant 0 : i32
    return %c0_i32, %c0_i32_0 : i32, i32
  }
  func.func @transform_3(%arg0: i32) -> (i32, i32) {
    %c0_i32 = arith.constant 0 : i32
    %c0_i32_0 = arith.constant 0 : i32
    %c0_i32_1 = arith.constant 0 : i32
    return %c0_i32, %c0_i32_0 : i32, i32
  }
  func.func @transform_4(%arg0: i32) -> (i32, i32) {
    %c0_i32 = arith.constant 0 : i32
    %c0_i32_0 = arith.constant 0 : i32
    %c0_i32_1 = arith.constant 0 : i32
    return %c0_i32, %c0_i32_0 : i32, i32
  }
  func.func @transform_5(%arg0: i32) -> (i32, i32) {
    %c0_i32 = arith.constant 0 : i32
    %c0_i32_0 = arith.constant 0 : i32
    %c0_i32_1 = arith.constant 0 : i32
    return %c0_i32, %c0_i32_0 : i32, i32
  }
  func.func @transform_6(%arg0: i32) -> (i32, i32) {
    %c0_i32 = arith.constant 0 : i32
    %c0_i32_0 = arith.constant 0 : i32
    %c0_i32_1 = arith.constant 0 : i32
    return %c0_i32, %c0_i32_0 : i32, i32
  }
  func.func @transform_7(%arg0: i32) -> (i32, i32) {
    %c0_i32 = arith.constant 0 : i32
    %c0_i32_0 = arith.constant 0 : i32
    return %arg0, %c0_i32 : i32, i32
  }
}

</mosaic_0001>

<bundles_post_ra>
// kernel: tpu_custom_call.1
= control target key start
LH: loop header
LB: loop body
LE: loop exit
PB: predicated region body
PF: predicated region fallthrough
CT: control target
= control target key end

     0   :  { %12 = vsyncpa [#allocation3], 0  ;;  %s381_s0 = inlined_call_operand.vmem [shape: f32[8,16], index: 0, kind: input, shape index: {}]   ;;  %s382_s1 = inlined_call_operand.hbm [shape: f32[16,32], index: 1, kind: input, shape index: {}]   ;;  %s383_s2 = inlined_call_operand.vmem [shape: f32[1,32], index: 2, kind: input, shape index: {}]   ;;  %s384_s3 = inlined_call_operand.vmem [shape: f32[32,32], index: 3, kind: input, shape index: {}]   ;;  %s385_s4 = inlined_call_operand.vmem [shape: f32[1,32], index: 4, kind: input, shape index: {}]   ;;  %s386_s5 = inlined_call_operand.vmem [shape: f32[32,8], index: 5, kind: input, shape index: {}]   ;;  %s387_s6 = inlined_call_operand.vmem [shape: f32[1,8], index: 6, kind: input, shape index: {}]   ;;  %s388_s7 = inlined_call_operand.hbm [shape: f32[8,8], index: 7, kind: output, shape index: {}]  }
   0x1   :  { %13 = vsyncpa [#allocation4], 0  ;;  %s20_s26 = sshll.u32 %s382_s1, 4  ;;  %s291_s27 = smov [#allocation2]   ;;  %s21_s26 = int_to_ptr.hbm [resolvable:$true] %s20_s26 }
   0x2   :  { %s22_s28 = sshll.u32 %s291_s27, 4  ;;  %s292_s29 = smov 128   ;;  %s23_s28 = int_to_ptr.vmem [resolvable:$true] %s22_s28 }
   0x3   :  { %s293_s30 = smov 8  }
   0x4   :  { %28 = dma.hbm_to_vmem [thread:$0]  %s21_s26, 256, %s23_s28, [#allocation3], %s292_s29, %s292_s29, %s293_s30  }
   0x5   :  { %287 = dma.done.wait [#allocation3], 256  }
   0x6   :  { %288 = vsyncadd [#allocation3], 4294967040  ;;  %v45_v0 = vld [vmem:[#allocation2 + $0x8] sm:$0xff]  ;;  %v44_v1 = vld [vmem:[#allocation2] sm:$0xff]  ;;  %vm50_vm0 = vcmask 130048   ;;  %vm85_vm2 = vcmask 261120  }
   0x7   :  { %68 = vmatpush.msra.mxu0 %v45_v0  ;;  %v43_v2 = vld [vmem:[%s381_s0] sm:$0xff]  ;;  %v80_v3 = vld [vmem:[%s384_s3 + $0x18] sm:$0xff]  ;;  %v79_v4 = vld [vmem:[%s384_s3 + $0x10] sm:$0xff]  ;;  %s213_s30 = sshll.u32 %s388_s7, 4  ;;  %vm204_vm6 = vcmask 64512   ;;  %s214_s30 = int_to_ptr.hbm [resolvable:$true] %s213_s30 }
   0x8   :  { %101 = vmatpush.msra.mxu1 %v80_v3  ;;  %127 = vmatpush.msra.mxu2 %v80_v3  ;;  %v78_v5 = vld [vmem:[%s384_s3 + $0x8] sm:$0xff]  ;;  %v77_v6 = vld [vmem:[%s384_s3] sm:$0xff]  ;;  %v167_v17 = vld [vmem:[%s386_s5 + $0x18] sm:$0xff] }
   0x9   :  { %69 = vmatpush.msra.mxu0 %v44_v1  ;;  %153 = vmatpush.msra.mxu3 %v80_v3  ;;  %v232_v7 = vld [vmem:[%s383_s2] ss:$0 sm:$0xff]  ;;  %v166_v22 = vld [vmem:[%s386_s5 + $0x10] sm:$0xff]  ;;  %v165_v23 = vld [vmem:[%s386_s5 + $0x8] sm:$0xff] }
   0xa   :  { %223 = vmatmul.msk.f32.vlgmr.msra.gmra.mxu0 %vm50_vm0, %v43_v2  ;;  %102 = vmatpush.msra.mxu1 %v79_v4  ;;  %v233_v12 = vld [vmem:[%s385_s4] ss:$0 sm:$0xff] }
   0xb   :  { %128 = vmatpush.msra.mxu2 %v79_v4  ;;  %154 = vmatpush.msra.mxu3 %v79_v4  ;;  %v164_v24 = vld [vmem:[%s386_s5] sm:$0xff]  ;;  %s294_s5 = smov [#allocation5]  }
   0xc   :  { %103 = vmatpush.msra.mxu1 %v78_v5  ;;  %187 = vmatpush.msrb.mxu0 %v167_v17  ;;  %v234_v29 = vld [vmem:[%s387_s6] ss:$0 sm:$0xff]  ;;  %s211_s27 = sshll.u32 %s294_s5, 4  ;;  %s212_s27 = int_to_ptr.vmem [resolvable:$true] %s211_s27 }
   0xd   :  { %129 = vmatpush.msra.mxu2 %v78_v5  ;;  %155 = vmatpush.msra.mxu3 %v78_v5 }
   0xe   :  { %104 = vmatpush.msra.mxu1 %v77_v6  ;;  %188 = vmatpush.msrb.mxu0 %v166_v22 }
   0xf   :  { %130 = vmatpush.msra.mxu2 %v77_v6  ;;  %156 = vmatpush.msra.mxu3 %v77_v6 }
  0x10   :  { %189 = vmatpush.msrb.mxu0 %v165_v23 }
  0x12   :  { %190 = vmatpush.msrb.mxu0 %v164_v24 }
  0x87   :  { %v71_v8 = vpop.f32.mrf.mxu0 }
  0x88   :  { %v72_v9 = vadd.f32 %v232_v7, %v71_v8 }
  0x8a   :  { %v75_v10 = vmul.f32 0.01, %v72_v9  ;;  %vm74_vm1 = vcmp.gt.f32.partialorder %v72_v9, 0.0 }
  0x8c   :  { %v76_v11 = vsel %vm74_vm1, %v72_v9, %v75_v10 }
  0x8d   :  { %224 = vmatmul.msk.f32.vlgmr.msra.gmra.mxu1 %vm85_vm2, %v76_v11 }
 0x10a   :  { %v106_v13 = vpop.f32.mrf.mxu1 }
 0x10b   :  { %v107_v14 = vadd.f32 %v233_v12, %v106_v13 }
 0x10d   :  { %v110_v15 = vmul.f32 0.01, %v107_v14  ;;  %vm109_vm3 = vcmp.gt.f32.partialorder %v107_v14, 0.0 }
 0x10f   :  { %v111_v16 = vsel %vm109_vm3, %v107_v14, %v110_v15 }
 0x110   :  { %225 = vmatmul.msk.f32.vlgmr.msra.gmra.mxu2 %vm85_vm2, %v111_v16 }
 0x193   :  { %v132_v18 = vpop.f32.mrf.mxu2 }
 0x194   :  { %v133_v19 = vadd.f32 %v233_v12, %v132_v18 }
 0x196   :  { %v136_v20 = vmul.f32 0.01, %v133_v19  ;;  %vm135_vm4 = vcmp.gt.f32.partialorder %v133_v19, 0.0 }
 0x198   :  { %v137_v21 = vsel %vm135_vm4, %v133_v19, %v136_v20 }
 0x199   :  { %226 = vmatmul.msk.f32.vlgmr.msra.gmra.mxu3 %vm85_vm2, %v137_v21 }
 0x21c   :  { %v158_v25 = vpop.f32.mrf.mxu3 }
 0x21d   :  { %v159_v26 = vadd.f32 %v233_v12, %v158_v25 }
 0x21f   :  { %vm161_vm5 = vcmp.gt.f32.partialorder %v159_v26, 0.0  ;;  %v162_v27 = vmul.f32 0.01, %v159_v26 }
 0x221   :  { %v163_v28 = vsel %vm161_vm5, %v159_v26, %v162_v27 }
 0x222   :  { %227 = vmatmul.msk.f32.vlgmr.msrb.gmra.mxu0 %vm85_vm2, %v163_v28 }
 0x29f   :  { %v192_v30 = vpop.f32.mrf.mxu0 }
 0x2a0   :  { %v193_v31 = vadd.f32 %v234_v29, %v192_v30 }
 0x2a2   :  { %v195_v32 = vand.u32 2147483647, %v193_v31  ;;  %vm201_vm7 = vcmp.ge.f32.partialorder %v193_v31, 0.0 }
 0x2a4   :  { %v196_v33 = vsub.f32 0.0, %v195_v32 }
 0x2a6   :  { %v197_v34 = vmul.f32 1.442695, %v196_v33 }
 0x2a8   :  { %235 = vpow2.f32 %v197_v34 }
 0x2ae   :  { %v236_v35 = vpop.eup %235 }
 0x2af   :  { %v199_v36 = vadd.f32 1.0, %v236_v35 }
 0x2b1   :  { %237 = vrcp.f32 %v199_v36 }
 0x2b7   :  { %v238_v37 = vpop.eup %237 }
 0x2b8   :  { %v202_v38 = vsub.f32 1.0, %v238_v37 }
 0x2ba   :  { %v203_v39 = vsel %vm201_vm7, %v238_v37, %v202_v38 }
 0x2bb   :  { %205 = vst.msk [vmem:[#allocation5] sm:$0xff] %vm204_vm6, %v203_v39 }
 0x2bc   :  { %216 = dma.vmem_to_hbm [thread:$0]  %s212_s27, 128, %s214_s30, [#allocation4]  }
 0x2bd   :  { %289 = dma.done.wait [#allocation4], 128  }
 0x2be   :  { %290 = vsyncadd [#allocation4], 4294967168 }
 0x2bf   :  { %221 = vsyncpa [#allocation3], 1 }
 0x2c0   :  { %222 = vsyncpa [#allocation4], 1 }

</bundles_post_ra>
